<compile_context>
chip_gen: v6e
topology: v6e:2x2x1
jax: 0.10.0
libtpu: 0.0.40
codegen_flags: <defaults>
</compile_context>

<pallas_src>
import jax
import jax.numpy as jnp
from jax.experimental import pallas as pl
from jax.experimental.pallas import tpu as pltpu


def generator_kernel(z_ref, w1_ref, b1_ref, w2_ref, b2_ref, o_ref):
    # Hidden layer: z (f32 -> bf16 in-kernel) @ W1 (bf16), f32 accumulation.
    z_bf = z_ref[...].astype(jnp.bfloat16)
    h = jnp.dot(z_bf, w1_ref[...], preferred_element_type=jnp.float32)
    h = h + b1_ref[...]                    # (TB, 256) + (1, 256) broadcast
    h = jnp.maximum(h, 0.1 * h)            # LeakyReLU(0.1), single VPU op

    # Output layer: h (cast to bf16 for the MXU) @ W2 + b2, tanh in f32.
    o = jnp.dot(h.astype(jnp.bfloat16), w2_ref[...],
                preferred_element_type=jnp.float32)
    o = o + b2_ref[...]                    # (TB, O) + (1, O)
    o_ref[...] = jnp.tanh(o).astype(o_ref.dtype)


def prepare_generator_params(w1, b1, w2, b2):
    """One-time parameter prep (call at init, NOT per forward).

    Casts matmul operands to bf16 (halves weight HBM traffic, native MXU
    dtype); biases stay f32 so the bias add is exact on the VPU.
    """
    return (w1.astype(jnp.bfloat16), b1.astype(jnp.float32),
            w2.astype(jnp.bfloat16), b2.astype(jnp.float32))


def _pick_block_b(B):
    """Batch-tile size.

    Tiny batches -> one tile (grid=1; extra steps buy nothing on single-TC
    v5e/v6e).  Batches >= 256 -> split in half (even grid >= 2 so v7x's two
    TensorCores both get work), capped at 512 rows per tile (double-buffered
    output tile stays ~3 MB, well under VMEM everywhere).
    """
    B8 = -(-B // 8) * 8                    # round up to a sublane multiple
    if B8 >= 256 and B8 % 16 == 0:
        return min(B8 // 2, 512)
    return min(B8, 512)


def generator_forward(z, params, *, out_dtype=jnp.float32):
    """Forward pass of the Generator.

    z      : (B, in_features) f32
    params : output of prepare_generator_params
             w1 (in_features, 256) bf16, b1 (1, 256) f32,
             w2 (256, out_features) bf16, b2 (1, out_features) f32
    returns (B, out_features) in out_dtype
    """
    w1, b1, w2, b2 = params
    B, Z = z.shape
    H = w1.shape[1]
    O = w2.shape[1]

    block_b = _pick_block_b(B)
    B_pad = -(-B // block_b) * block_b
    if B_pad != B:                         # only for batches not a multiple of 8
        z = jnp.pad(z, ((0, B_pad - B), (0, 0)))

    grid = (B_pad // block_b,)

    out = pl.pallas_call(
        generator_kernel,
        out_shape=jax.ShapeDtypeStruct((B_pad, O), out_dtype),
        grid=grid,
        in_specs=[
            pl.BlockSpec((block_b, Z), lambda i: (i, 0)),   # z tile per step
            pl.BlockSpec((Z, H),       lambda i: (0, 0)),   # W1 resident in VMEM
            pl.BlockSpec((1, H),       lambda i: (0, 0)),   # b1 resident
            pl.BlockSpec((H, O),       lambda i: (0, 0)),   # W2 resident
            pl.BlockSpec((1, O),       lambda i: (0, 0)),   # b2 resident
        ],
        # Full-width output block (last dim == full array dim): dense stores
        # for 6 x 128-lane groups + one 16-lane masked tail, no post-slice.
        out_specs=pl.BlockSpec((block_b, O), lambda i: (i, 0)),
        compiler_params=pltpu.CompilerParams(
            dimension_semantics=("parallel",)),
    )(z, w1, b1, w2, b2)

    if B_pad != B:
        out = out[:B]
    return out


def init_generator_params(key, in_features, out_features=784, hidden=256):
    """Deterministic synthetic parameters (PyTorch-style uniform fan-in init)."""
    k1, k2, k3, k4 = jax.random.split(key, 4)
    bound1 = 1.0 / jnp.sqrt(in_features)
    bound2 = 1.0 / jnp.sqrt(hidden)
    w1 = jax.random.uniform(k1, (in_features, hidden), jnp.float32, -bound1, bound1)
    b1 = jax.random.uniform(k2, (1, hidden), jnp.float32, -bound1, bound1)
    w2 = jax.random.uniform(k3, (hidden, out_features), jnp.float32, -bound2, bound2)
    b2 = jax.random.uniform(k4, (1, out_features), jnp.float32, -bound2, bound2)
    return w1, b1, w2, b2


if __name__ == "__main__":
    key = jax.random.PRNGKey(0)
    kz, kp = jax.random.split(key)

    batch = 16          # small demo batch (multiple of 8 -> no row padding)
    z_dim = 64          # in_features (z dimension)
    out_features = 784  # module default (flattened 28x28 MNIST)

    z = jax.random.normal(kz, (batch, z_dim), jnp.float32)
    w1, b1, w2, b2 = init_generator_params(kp, z_dim, out_features)

    # One-time param prep (hoisted out of the per-call forward path).
    params = prepare_generator_params(w1, b1, w2, b2)

    gz = generator_forward(z, params)
    gz = jax.block_until_ready(gz)
    assert gz.shape == (batch, out_features)

    # Reference 1: same bf16-operand / f32-accum math in plain JAX (tight tol).
    w1_bf, b1_f, w2_bf, b2_f = params
    h_bf = jnp.dot(z.astype(jnp.bfloat16), w1_bf,
                   preferred_element_type=jnp.float32) + b1_f
    h_bf = jnp.maximum(h_bf, 0.1 * h_bf)
    ref_bf = jnp.tanh(
        jnp.dot(h_bf.astype(jnp.bfloat16), w2_bf,
                preferred_element_type=jnp.float32) + b2_f)
    assert jnp.allclose(gz, ref_bf, atol=5e-3, rtol=0), \
        float(jnp.max(jnp.abs(gz - ref_bf)))

    # Reference 2: full-f32 module math (loose tol: bf16 matmul operands).
    h_ref = z @ w1 + b1
    h_ref = jnp.where(h_ref >= 0, h_ref, 0.1 * h_ref)
    ref = jnp.tanh(h_ref @ w2 + b2)
    assert jnp.allclose(gz, ref, atol=5e-2, rtol=0), \
        float(jnp.max(jnp.abs(gz - ref)))

    print("KERNEL_OK")
</pallas_src>

<mosaic_0001>
module attributes {stable_mosaic.version = 11 : i64} {
  func.func @generator_kernel(%arg0: i32, %arg1: memref<16x64xf32, #tpu.memory_space<vmem>>, %arg2: memref<64x256xbf16, #tpu.memory_space<vmem>>, %arg3: memref<1x256xf32, #tpu.memory_space<vmem>>, %arg4: memref<256x784xbf16, #tpu.memory_space<vmem>>, %arg5: memref<1x784xf32, #tpu.memory_space<vmem>>, %arg6: memref<16x784xf32, #tpu.memory_space<vmem>>) attributes {dimension_semantics = [#tpu.dimension_semantics<parallel>], iteration_bounds = array<i64: 1>, scalar_prefetch = 0 : i64, scratch_operands = 0 : i64, tpu.core_type = #tpu.core_type<tc>, window_params = [{transform_indices = @transform_0, window_bounds = array<i64: 16, 64>}, {pipeline_mode = #tpu.pipeline_mode<synchronous>, transform_indices = @transform_1, window_bounds = array<i64: 64, 256>}, {pipeline_mode = #tpu.pipeline_mode<synchronous>, transform_indices = @transform_2, window_bounds = array<i64: 1, 256>}, {pipeline_mode = #tpu.pipeline_mode<synchronous>, transform_indices = @transform_3, window_bounds = array<i64: 256, 784>}, {pipeline_mode = #tpu.pipeline_mode<synchronous>, transform_indices = @transform_4, window_bounds = array<i64: 1, 784>}, {transform_indices = @transform_5, window_bounds = array<i64: 16, 784>}]} {
    %c0 = arith.constant 0 : index
    %c0_0 = arith.constant 0 : index
    %0 = vector.load %arg1[%c0, %c0_0] : memref<16x64xf32, #tpu.memory_space<vmem>>, vector<16x64xf32>
    %1 = arith.truncf %0 : vector<16x64xf32> to vector<16x64xbf16>
    %c0_1 = arith.constant 0 : index
    %c0_2 = arith.constant 0 : index
    %2 = vector.load %arg2[%c0_1, %c0_2] : memref<64x256xbf16, #tpu.memory_space<vmem>>, vector<64x256xbf16>
    %cst = arith.constant dense<0.000000e+00> : vector<16x256xf32>
    %3 = tpu.matmul %1, %2, %cst {dimension_numbers = #tpu.dot_dimension_numbers<[1], [0], [0], [1], [0, 0, 1, 1], [], []>} : vector<16x64xbf16>, vector<64x256xbf16>, vector<16x256xf32> -> vector<16x256xf32>
    %c0_3 = arith.constant 0 : index
    %c0_4 = arith.constant 0 : index
    %4 = vector.load %arg3[%c0_3, %c0_4] : memref<1x256xf32, #tpu.memory_space<vmem>>, vector<1x256xf32>
    %5 = vector.broadcast %4 : vector<1x256xf32> to vector<16x256xf32>
    %6 = arith.addf %3, %5 : vector<16x256xf32>
    %cst_5 = arith.constant 1.000000e-01 : f32
    %7 = vector.broadcast %cst_5 : f32 to vector<16x256xf32>
    %8 = arith.mulf %7, %6 : vector<16x256xf32>
    %9 = arith.maximumf %6, %8 : vector<16x256xf32>
    %10 = arith.truncf %9 : vector<16x256xf32> to vector<16x256xbf16>
    %c0_6 = arith.constant 0 : index
    %c0_7 = arith.constant 0 : index
    %11 = vector.load %arg4[%c0_6, %c0_7] : memref<256x784xbf16, #tpu.memory_space<vmem>>, vector<256x784xbf16>
    %cst_8 = arith.constant dense<0.000000e+00> : vector<16x784xf32>
    %12 = tpu.matmul %10, %11, %cst_8 {dimension_numbers = #tpu.dot_dimension_numbers<[1], [0], [0], [1], [0, 0, 1, 1], [], []>} : vector<16x256xbf16>, vector<256x784xbf16>, vector<16x784xf32> -> vector<16x784xf32>
    %c0_9 = arith.constant 0 : index
    %c0_10 = arith.constant 0 : index
    %13 = vector.load %arg5[%c0_9, %c0_10] : memref<1x784xf32, #tpu.memory_space<vmem>>, vector<1x784xf32>
    %14 = vector.broadcast %13 : vector<1x784xf32> to vector<16x784xf32>
    %15 = arith.addf %12, %14 : vector<16x784xf32>
    %16 = math.tanh %15 : vector<16x784xf32>
    %c0_11 = arith.constant 0 : index
    %c0_12 = arith.constant 0 : index
    %17 = vector.load %arg6[%c0_11, %c0_12] : memref<16x784xf32, #tpu.memory_space<vmem>>, vector<16x784xf32>
    tpu.vector_store %arg6[%c0_11, %c0_12], %16 {strides = array<i32>} : memref<16x784xf32, #tpu.memory_space<vmem>>, vector<16x784xf32>,
    return
  }
  func.func @transform_0(%arg0: i32) -> (i32, i32) {
    %c0_i32 = arith.constant 0 : i32
    %c0_i32_0 = arith.constant 0 : i32
    return %arg0, %c0_i32 : i32, i32
  }
  func.func @transform_1(%arg0: i32) -> (i32, i32) {
    %c0_i32 = arith.constant 0 : i32
    %c0_i32_0 = arith.constant 0 : i32
    %c0_i32_1 = arith.constant 0 : i32
    return %c0_i32, %c0_i32_0 : i32, i32
  }
  func.func @transform_2(%arg0: i32) -> (i32, i32) {
    %c0_i32 = arith.constant 0 : i32
    %c0_i32_0 = arith.constant 0 : i32
    %c0_i32_1 = arith.constant 0 : i32
    return %c0_i32, %c0_i32_0 : i32, i32
  }
  func.func @transform_3(%arg0: i32) -> (i32, i32) {
    %c0_i32 = arith.constant 0 : i32
    %c0_i32_0 = arith.constant 0 : i32
    %c0_i32_1 = arith.constant 0 : i32
    return %c0_i32, %c0_i32_0 : i32, i32
  }
  func.func @transform_4(%arg0: i32) -> (i32, i32) {
    %c0_i32 = arith.constant 0 : i32
    %c0_i32_0 = arith.constant 0 : i32
    %c0_i32_1 = arith.constant 0 : i32
    return %c0_i32, %c0_i32_0 : i32, i32
  }
  func.func @transform_5(%arg0: i32) -> (i32, i32) {
    %c0_i32 = arith.constant 0 : i32
    %c0_i32_0 = arith.constant 0 : i32
    return %arg0, %c0_i32 : i32, i32
  }
}

</mosaic_0001>

<bundles_post_ra>
// kernel: tpu_custom_call.1
= control target key start
LH: loop header
LB: loop body
LE: loop exit
PB: predicated region body
PF: predicated region fallthrough
CT: control target
= control target key end

     0   :  { %v1467_v2 = vmov 0   ;;  %vm85_vm0 = vcmask 523264   ;;  %s1908_s0 = inlined_call_operand.vmem [shape: f32[16,64], index: 0, kind: input, shape index: {}]   ;;  %s1909_s1 = inlined_call_operand.vmem [shape: bf16[64,256], index: 1, kind: input, shape index: {}]   ;;  %s1910_s2 = inlined_call_operand.vmem [shape: f32[1,256], index: 2, kind: input, shape index: {}]   ;;  %s1911_s3 = inlined_call_operand.vmem [shape: bf16[256,784], index: 3, kind: input, shape index: {}]   ;;  %s1912_s4 = inlined_call_operand.vmem [shape: f32[1,784], index: 4, kind: input, shape index: {}]   ;;  %s1913_s5 = inlined_call_operand.hbm [shape: f32[16,784], index: 5, kind: output, shape index: {}]  }
   0x1   :  { %v1245_v0 = vld [vmem:[%s1909_s1 + $0x34] ss:$8 sps:$4 sm:$0xff]   ;;  %v1247_v1 = vld [vmem:[%s1909_s1 + $0x30] ss:$8 sps:$4 sm:$0xff]   ;;  %121 = vmatprep.mubr.bf16.mxu0 %v1467_v2  ;;  %v1248_v3 = vld [vmem:[%s1909_s1 + $0x24] ss:$8 sps:$4 sm:$0xff]  }
   0x2   :  { %97 = vmatprep.subr.bf16.mxu0 %v1245_v0  ;;  %v1250_v4 = vld [vmem:[%s1909_s1 + $0x20] ss:$8 sps:$4 sm:$0xff]   ;;  %v1251_v5 = vld [vmem:[%s1909_s1 + $0x14] ss:$8 sps:$4 sm:$0xff]   ;;  %v1253_v7 = vld [vmem:[%s1909_s1 + $0x10] ss:$8 sps:$4 sm:$0xff]  }
   0x3   :  { %98 = vmatpush1.bf16.msra.mxu0 %v1247_v1  ;;  %v1257_v6 = vld [vmem:[%s1911_s3 + $0x18c] ss:$28 sps:$4 sm:$0xff]   ;;  %v22_v11 = vld [vmem:[%s1908_s0] sm:$0xff]  ;;  %v1263_v12 = vld [vmem:[%s1911_s3 + $0x154] ss:$28 sps:$4 sm:$0xff]  }
   0x4   :  { %99 = vmatprep.subr.bf16.mxu0 %v1248_v3  ;;  %v1254_v8 = vld [vmem:[%s1909_s1 + $0x4] ss:$8 sps:$4 sm:$0xff]   ;;  %883 = vmatprep.subr.bf16.mxu1 %v1257_v6  ;;  %v1256_v10 = vld [vmem:[%s1909_s1] ss:$8 sps:$4 sm:$0xff]   ;;  %v1261_v14 = vld [vmem:[%s1911_s3 + $0x194] ss:$28 sps:$4 sm:$0xff]  }
   0x5   :  { %v1262_v9 = vld [vmem:[%s1911_s3 + $0x188] ss:$28 sps:$4 sm:$0xff]   ;;  %v1268_v15 = vld [vmem:[%s1911_s3 + $0x150] ss:$28 sps:$4 sm:$0xff]   ;;  %v1269_v16 = vld [vmem:[%s1911_s3 + $0x11c] ss:$28 sps:$4 sm:$0xff]  }
   0x6   :  { %v23_v13 = vld [vmem:[%s1908_s0 + $0x8] sm:$0xff]  ;;  %884 = vmatpush1.bf16.msra.mxu1 %v1262_v9  ;;  %v1274_v19 = vld [vmem:[%s1911_s3 + $0x118] ss:$28 sps:$4 sm:$0xff]   ;;  %v1275_v20 = vld [vmem:[%s1911_s3 + $0xe4] ss:$28 sps:$4 sm:$0xff]  }
   0x7   :  { %100 = vmatpush1.bf16.msra.mxu0 %v1250_v4  ;;  %885 = vmatprep.subr.bf16.mxu1 %v1263_v12  ;;  %v1259_v17 = vld [vmem:[%s1911_s3 + $0x190] ss:$28 sps:$4 sm:$0xff]   ;;  %v24_v18 = vpack.c.bf16 %v23_v13, %v22_v11  ;;  %v1267_v21 = vld [vmem:[%s1911_s3 + $0x15c] ss:$28 sps:$4 sm:$0xff]   ;;  %v1273_v25 = vld [vmem:[%s1911_s3 + $0x124] ss:$28 sps:$4 sm:$0xff]  }
   0x8   :  { %101 = vmatprep.subr.bf16.mxu0 %v1251_v5  ;;  %v1265_v22 = vld [vmem:[%s1911_s3 + $0x158] ss:$28 sps:$4 sm:$0xff]   ;;  %v1280_v23 = vld [vmem:[%s1911_s3 + $0xe0] ss:$28 sps:$4 sm:$0xff]   ;;  %v1281_v24 = vld [vmem:[%s1911_s3 + $0xac] ss:$28 sps:$4 sm:$0xff]  }
   0x9   :  { %v1271_v26 = vld [vmem:[%s1911_s3 + $0x120] ss:$28 sps:$4 sm:$0xff]   ;;  %v1286_v27 = vld [vmem:[%s1911_s3 + $0xa8] ss:$28 sps:$4 sm:$0xff]   ;;  %v1287_v28 = vld [vmem:[%s1911_s3 + $0x74] ss:$28 sps:$4 sm:$0xff]  }
   0xa   :  { %886 = vmatpush1.bf16.msra.mxu1 %v1268_v15  ;;  %v1279_v29 = vld [vmem:[%s1911_s3 + $0xec] ss:$28 sps:$4 sm:$0xff]   ;;  %v1293_v32 = vld [vmem:[%s1911_s3 + $0x3c] ss:$28 sps:$4 sm:$0xff]   ;;  %v1285_v33 = vld [vmem:[%s1911_s3 + $0xb4] ss:$28 sps:$4 sm:$0xff]  }
   0xb   :  { %102 = vmatpush1.bf16.msra.mxu0 %v1253_v7  ;;  %887 = vmatprep.subr.bf16.mxu1 %v1269_v16  ;;  %v1277_v30 = vld [vmem:[%s1911_s3 + $0xe8] ss:$28 sps:$4 sm:$0xff]   ;;  %v1292_v31 = vld [vmem:[%s1911_s3 + $0x70] ss:$28 sps:$4 sm:$0xff]   ;;  %v1298_v35 = vld [vmem:[%s1911_s3 + $0x38] ss:$28 sps:$4 sm:$0xff]  }
   0xc   :  { %103 = vmatprep.subr.bf16.mxu0 %v1254_v8  ;;  %v1283_v34 = vld [vmem:[%s1911_s3 + $0xb0] ss:$28 sps:$4 sm:$0xff]   ;;  %v1299_v36 = vld [vmem:[%s1911_s3 + $0x4] ss:$28 sps:$4 sm:$0xff]   ;;  %v1291_v37 = vld [vmem:[%s1911_s3 + $0x7c] ss:$28 sps:$4 sm:$0xff]  }
   0xd   :  { %v1289_v38 = vld [vmem:[%s1911_s3 + $0x78] ss:$28 sps:$4 sm:$0xff]   ;;  %v1304_v39 = vld [vmem:[%s1911_s3] ss:$28 sps:$4 sm:$0xff]   ;;  %v1305_v40 = vld [vmem:[%s1911_s3 + $0x34c] ss:$28 sps:$4 sm:$0xff]  }
   0xe   :  { %888 = vmatpush1.bf16.msra.mxu1 %v1274_v19  ;;  %v1297_v41 = vld [vmem:[%s1911_s3 + $0x44] ss:$28 sps:$4 sm:$0xff]   ;;  %v1311_v44 = vld [vmem:[%s1911_s3 + $0x314] ss:$28 sps:$4 sm:$0xff]   ;;  %v1303_v45 = vld [vmem:[%s1911_s3 + $0xc] ss:$28 sps:$4 sm:$0xff]  }
   0xf   :  { %104 = vmatpush1.bf16.msra.mxu0 %v1256_v10  ;;  %889 = vmatprep.subr.bf16.mxu1 %v1275_v20  ;;  %v1295_v42 = vld [vmem:[%s1911_s3 + $0x40] ss:$28 sps:$4 sm:$0xff]   ;;  %v1310_v43 = vld [vmem:[%s1911_s3 + $0x348] ss:$28 sps:$4 sm:$0xff]   ;;  %v1316_v46 = vld [vmem:[%s1911_s3 + $0x310] ss:$28 sps:$4 sm:$0xff]  }
  0x10   :  { %926 = vmatprep.subr.bf16.mxu0 %v1261_v14  ;;  %v1301_v47 = vld [vmem:[%s1911_s3 + $0x8] ss:$28 sps:$4 sm:$0xff]   ;;  %v1317_v48 = vld [vmem:[%s1911_s3 + $0x2dc] ss:$28 sps:$4 sm:$0xff]   ;;  %v1309_v49 = vld [vmem:[%s1911_s3 + $0x354] ss:$28 sps:$4 sm:$0xff]  }
  0x11   :  { %v1322_v50 = vld [vmem:[%s1911_s3 + $0x2d8] ss:$28 sps:$4 sm:$0xff]   ;;  %v1307_v51 = vld [vmem:[%s1911_s3 + $0x350] ss:$28 sps:$4 sm:$0xff]   ;;  %v1323_v52 = vld [vmem:[%s1911_s3 + $0x2a4] ss:$28 sps:$4 sm:$0xff]  }
  0x12   :  { %1106 = vmatmul.mubr.msk.bf16.vlgmr.msra.gmra.mxu0 %vm85_vm0, %v24_v18  ;;  %890 = vmatpush1.bf16.msra.mxu1 %v1280_v23  ;;  %v1315_v53 = vld [vmem:[%s1911_s3 + $0x31c] ss:$28 sps:$4 sm:$0xff]   ;;  %v1329_v56 = vld [vmem:[%s1911_s3 + $0x26c] ss:$28 sps:$4 sm:$0xff]   ;;  %v1321_v57 = vld [vmem:[%s1911_s3 + $0x2e4] ss:$28 sps:$4 sm:$0xff]  }
  0x13   :  { %927 = vmatpush1.bf16.msra.mxu0 %v1259_v17  ;;  %891 = vmatprep.subr.bf16.mxu1 %v1281_v24  ;;  %v1328_v54 = vld [vmem:[%s1911_s3 + $0x2a0] ss:$28 sps:$4 sm:$0xff]   ;;  %v1313_v55 = vld [vmem:[%s1911_s3 + $0x318] ss:$28 sps:$4 sm:$0xff]   ;;  %v1327_v59 = vld [vmem:[%s1911_s3 + $0x2ac] ss:$28 sps:$4 sm:$0xff]  }
  0x14   :  { %928 = vmatprep.subr.bf16.mxu0 %v1267_v21  ;;  %v1319_v58 = vld [vmem:[%s1911_s3 + $0x2e0] ss:$28 sps:$4 sm:$0xff]   ;;  %v1325_v60 = vld [vmem:[%s1911_s3 + $0x2a8] ss:$28 sps:$4 sm:$0xff]   ;;  %v1333_v61 = vld [vmem:[%s1911_s3 + $0x274] ss:$28 sps:$4 sm:$0xff]  }
  0x15   :  { %v1331_v62 = vld [vmem:[%s1911_s3 + $0x270] ss:$28 sps:$4 sm:$0xff]  }
  0x16   :  { %892 = vmatpush1.bf16.msra.mxu1 %v1286_v27 }
  0x17   :  { %929 = vmatpush1.bf16.msra.mxu0 %v1265_v22  ;;  %893 = vmatprep.subr.bf16.mxu1 %v1287_v28 }
  0x18   :  { %930 = vmatprep.subr.bf16.mxu0 %v1273_v25 }
  0x1a   :  { %894 = vmatpush1.bf16.msra.mxu1 %v1292_v31 }
  0x1b   :  { %931 = vmatpush1.bf16.msra.mxu0 %v1271_v26  ;;  %895 = vmatprep.subr.bf16.mxu1 %v1293_v32 }
  0x1c   :  { %932 = vmatprep.subr.bf16.mxu0 %v1279_v29 }
  0x1e   :  { %896 = vmatpush1.bf16.msra.mxu1 %v1298_v35 }
  0x1f   :  { %933 = vmatpush1.bf16.msra.mxu0 %v1277_v30  ;;  %897 = vmatprep.subr.bf16.mxu1 %v1299_v36 }
  0x20   :  { %934 = vmatprep.subr.bf16.mxu0 %v1285_v33 }
  0x22   :  { %898 = vmatpush1.bf16.msra.mxu1 %v1304_v39 }
  0x23   :  { %935 = vmatpush1.bf16.msra.mxu0 %v1283_v34  ;;  %899 = vmatprep.subr.bf16.mxu1 %v1305_v40 }
  0x24   :  { %936 = vmatprep.subr.bf16.mxu0 %v1291_v37 }
  0x26   :  { %900 = vmatpush2.bf16.msra.mxu1 %v1310_v43 }
  0x27   :  { %937 = vmatpush1.bf16.msra.mxu0 %v1289_v38  ;;  %901 = vmatprep.subr.bf16.mxu1 %v1311_v44 }
  0x28   :  { %938 = vmatprep.subr.bf16.mxu0 %v1297_v41 }
  0x2a   :  { %902 = vmatpush2.bf16.msra.mxu1 %v1316_v46 }
  0x2b   :  { %939 = vmatpush1.bf16.msra.mxu0 %v1295_v42  ;;  %903 = vmatprep.subr.bf16.mxu1 %v1317_v48 }
  0x2c   :  { %940 = vmatprep.subr.bf16.mxu0 %v1303_v45 }
  0x2e   :  { %904 = vmatpush2.bf16.msra.mxu1 %v1322_v50 }
  0x2f   :  { %941 = vmatpush1.bf16.msra.mxu0 %v1301_v47  ;;  %905 = vmatprep.subr.bf16.mxu1 %v1323_v52 }
  0x30   :  { %942 = vmatprep.subr.bf16.mxu0 %v1309_v49 }
  0x32   :  { %906 = vmatpush2.bf16.msra.mxu1 %v1328_v54 }
  0x33   :  { %943 = vmatpush2.bf16.msra.mxu0 %v1307_v51  ;;  %907 = vmatprep.subr.bf16.mxu1 %v1329_v56 }
  0x34   :  { %944 = vmatprep.subr.bf16.mxu0 %v1315_v53 }
  0x37   :  { %945 = vmatpush2.bf16.msra.mxu0 %v1313_v55 }
  0x38   :  { %946 = vmatprep.subr.bf16.mxu0 %v1321_v57 }
  0x3b   :  { %947 = vmatpush2.bf16.msra.mxu0 %v1319_v58 }
  0x3c   :  { %948 = vmatprep.subr.bf16.mxu0 %v1327_v59 }
  0x3f   :  { %949 = vmatpush2.bf16.msra.mxu0 %v1325_v60 }
  0x40   :  { %950 = vmatprep.subr.bf16.mxu0 %v1333_v61 }
  0x41   :  { %10 = vsyncpa [#allocation3], 0  ;;  %v1334_v63 = vld [vmem:[%s1911_s3 + $0x268] ss:$28 sps:$4 sm:$0xff]   ;;  %v1335_v0 = vld [vmem:[%s1911_s3 + $0x234] ss:$28 sps:$4 sm:$0xff]   ;;  %v35_v14 = vlaneseq }
  0x42   :  { %908 = vmatpush2.bf16.msra.mxu1 %v1334_v63  ;;  %v1339_v1 = vld [vmem:[%s1911_s3 + $0x23c] ss:$28 sps:$4 sm:$0xff]   ;;  %v1340_v3 = vld [vmem:[%s1911_s3 + $0x230] ss:$28 sps:$4 sm:$0xff]   ;;  %v1345_v5 = vld [vmem:[%s1911_s3 + $0x204] ss:$28 sps:$4 sm:$0xff]  }
  0x43   :  { %951 = vmatpush2.bf16.msra.mxu0 %v1331_v62  ;;  %v1337_v2 = vld [vmem:[%s1911_s3 + $0x238] ss:$28 sps:$4 sm:$0xff]   ;;  %909 = vmatprep.subr.bf16.mxu1 %v1335_v0  ;;  %v1343_v6 = vld [vmem:[%s1911_s3 + $0x200] ss:$28 sps:$4 sm:$0xff]   ;;  %v1351_v9 = vld [vmem:[%s1911_s3 + $0x1cc] ss:$28 sps:$4 sm:$0xff]  }
  0x44   :  { %952 = vmatprep.subr.bf16.mxu0 %v1339_v1  ;;  %v1341_v4 = vld [vmem:[%s1911_s3 + $0x1fc] ss:$28 sps:$4 sm:$0xff]   ;;  %v1347_v8 = vld [vmem:[%s1911_s3 + $0x1c4] ss:$28 sps:$4 sm:$0xff]   ;;  %v1729_v15 = vshrl.u32 %v35_v14, 7  ;;  %vm1073_vm1 = vcmask 130048  }
  0x45   :  { %v1346_v7 = vld [vmem:[%s1911_s3 + $0x1f8] ss:$28 sps:$4 sm:$0xff]   ;;  %v1349_v10 = vld [vmem:[%s1911_s3 + $0x1c8] ss:$28 sps:$4 sm:$0xff]   ;;  %v1352_v11 = vld [vmem:[%s1911_s3 + $0x1c0] ss:$28 sps:$4 sm:$0xff]  }
  0x46   :  { %910 = vmatpush2.bf16.msra.mxu1 %v1340_v3  ;;  %v1355_v12 = vld [vmem:[%s1911_s3 + $0x19c] ss:$28 sps:$4 sm:$0xff]   ;;  %v41_v16 = vsub.s32 1, %v1729_v15  ;;  %v37_v17 = vsub.s32 0, %v1729_v15  ;;  %v33_v18 = vld [vmem:[%s1910_s2] sm:$0x3] }
  0x47   :  { %953 = vmatpush2.bf16.msra.mxu0 %v1337_v2  ;;  %911 = vmatprep.subr.bf16.mxu1 %v1341_v4  ;;  %v1356_v13 = vld [vmem:[%s1911_s3 + $0x360] ss:$28 sps:$4 sm:$0xff]   ;;  %v1353_v38 = vld [vmem:[%s1911_s3 + $0x198] ss:$28 sps:$4 sm:$0xff]   ;;  %v1361_v42 = vld [vmem:[%s1911_s3 + $0x328] ss:$28 sps:$4 sm:$0xff]  }
  0x48   :  { %954 = vmatprep.subr.bf16.mxu0 %v1345_v5  ;;  %v42_v19 = vrot.slane %v33_v18, %v41_v16  ;;  %v38_v20 = vrot.slane %v33_v18, %v37_v17  ;;  %v1357_v39 = vld [vmem:[%s1911_s3 + $0x1a0] ss:$28 sps:$4 sm:$0xff]   ;;  %v1362_v44 = vld [vmem:[%s1911_s3 + $0x168] ss:$28 sps:$4 sm:$0xff]   ;;  %v1366_v46 = vld [vmem:[%s1911_s3 + $0x2f0] ss:$28 sps:$4 sm:$0xff]  }
  0x49   :  { %v1360_v41 = vld [vmem:[%s1911_s3 + $0x164] ss:$28 sps:$4 sm:$0xff]   ;;  %v1365_v45 = vld [vmem:[%s1911_s3 + $0x12c] ss:$28 sps:$4 sm:$0xff]   ;;  %v1370_v49 = vld [vmem:[%s1911_s3 + $0xf4] ss:$28 sps:$4 sm:$0xff]  }
  0x4a   :  { %912 = vmatpush2.bf16.msra.mxu1 %v1346_v7  ;;  %v1358_v43 = vld [vmem:[%s1911_s3 + $0x160] ss:$28 sps:$4 sm:$0xff]   ;;  %v1363_v47 = vld [vmem:[%s1911_s3 + $0x128] ss:$28 sps:$4 sm:$0xff]   ;;  %v1367_v48 = vld [vmem:[%s1911_s3 + $0x130] ss:$28 sps:$4 sm:$0xff]  }
  0x4b   :  { %955 = vmatpush2.bf16.msra.mxu0 %v1343_v6  ;;  %913 = vmatprep.subr.bf16.mxu1 %v1347_v8  ;;  %v1371_v50 = vld [vmem:[%s1911_s3 + $0x2b8] ss:$28 sps:$4 sm:$0xff]   ;;  %v1368_v51 = vld [vmem:[%s1911_s3 + $0xf0] ss:$28 sps:$4 sm:$0xff]   ;;  %v1376_v54 = vld [vmem:[%s1911_s3 + $0x280] ss:$28 sps:$4 sm:$0xff]  }
  0x4c   :  { %956 = vmatprep.subr.bf16.mxu0 %v1351_v9  ;;  %v1372_v52 = vld [vmem:[%s1911_s3 + $0xf8] ss:$28 sps:$4 sm:$0xff]   ;;  %v1377_v56 = vld [vmem:[%s1911_s3 + $0xc0] ss:$28 sps:$4 sm:$0xff]   ;;  %v1381_v58 = vld [vmem:[%s1911_s3 + $0x248] ss:$28 sps:$4 sm:$0xff]  }
  0x4d   :  { %v1375_v53 = vld [vmem:[%s1911_s3 + $0xbc] ss:$28 sps:$4 sm:$0xff]   ;;  %v1380_v57 = vld [vmem:[%s1911_s3 + $0x84] ss:$28 sps:$4 sm:$0xff]   ;;  %v1385_v61 = vld [vmem:[%s1911_s3 + $0x4c] ss:$28 sps:$4 sm:$0xff]  }
  0x4e   :  { %914 = vmatpush2.bf16.msra.mxu1 %v1352_v11  ;;  %v1373_v55 = vld [vmem:[%s1911_s3 + $0xb8] ss:$28 sps:$4 sm:$0xff]   ;;  %v1378_v59 = vld [vmem:[%s1911_s3 + $0x80] ss:$28 sps:$4 sm:$0xff]   ;;  %v1382_v60 = vld [vmem:[%s1911_s3 + $0x88] ss:$28 sps:$4 sm:$0xff]  }
  0x4f   :  { %957 = vmatpush2.bf16.msra.mxu0 %v1349_v10  ;;  %969 = vmatprep.subr.bf16.mxu1 %v1355_v12  ;;  %v1386_v62 = vld [vmem:[%s1911_s3 + $0x210] ss:$28 sps:$4 sm:$0xff]   ;;  %v1383_v63 = vld [vmem:[%s1911_s3 + $0x48] ss:$28 sps:$4 sm:$0xff]   ;;  %v1391_v2 = vld [vmem:[%s1911_s3 + $0x1d8] ss:$28 sps:$4 sm:$0xff]  }
  0x50   :  { %1219 = vmatprep.subr.bf16.mxu0 %v1356_v13  ;;  %v1387_v0 = vld [vmem:[%s1911_s3 + $0x50] ss:$28 sps:$4 sm:$0xff]   ;;  %v1392_v4 = vld [vmem:[%s1911_s3 + $0x18] ss:$28 sps:$4 sm:$0xff]   ;;  %v1398_v7 = vld [vmem:[%s1911_s3 + $0x324] ss:$28 sps:$4 sm:$0xff]  }
  0x51   :  { %v1390_v1 = vld [vmem:[%s1911_s3 + $0x14] ss:$28 sps:$4 sm:$0xff]   ;;  %v1395_v5 = vld [vmem:[%s1911_s3 + $0x35c] ss:$28 sps:$4 sm:$0xff]   ;;  %v1401_v9 = vld [vmem:[%s1911_s3 + $0x2ec] ss:$28 sps:$4 sm:$0xff]  }
  0x52   :  { %v1388_v3 = vld [vmem:[%s1911_s3 + $0x10] ss:$28 sps:$4 sm:$0xff]   ;;  %v1393_v6 = vld [vmem:[%s1911_s3 + $0x358] ss:$28 sps:$4 sm:$0xff]   ;;  %v1396_v8 = vld [vmem:[%s1911_s3 + $0x320] ss:$28 sps:$4 sm:$0xff]  }
  0x53   :  { %v1399_v10 = vld [vmem:[%s1911_s3 + $0x2e8] ss:$28 sps:$4 sm:$0xff]   ;;  %v1404_v11 = vld [vmem:[%s1911_s3 + $0x2b4] ss:$28 sps:$4 sm:$0xff]   ;;  %v1407_v13 = vld [vmem:[%s1911_s3 + $0x27c] ss:$28 sps:$4 sm:$0xff]  }
  0x54   :  { %v1402_v12 = vld [vmem:[%s1911_s3 + $0x2b0] ss:$28 sps:$4 sm:$0xff]   ;;  %v1405_v14 = vld [vmem:[%s1911_s3 + $0x278] ss:$28 sps:$4 sm:$0xff]   ;;  %v1410_v18 = vld [vmem:[%s1911_s3 + $0x244] ss:$28 sps:$4 sm:$0xff]  }
  0xd2   :  { %v123_v21 = vpop.f32.mrf.mxu0 }
  0xd3   :  { %v124_v24 = vadd.f32 %v123_v21, %v38_v20  ;;  %v1411_v21 = vld [vmem:[%s1911_s3 + $0x208] ss:$28 sps:$4 sm:$0xff]  }
  0xd4   :  { %v125_v22 = vpop.f32.mrf.mxu0 }
  0xd5   :  { %v126_v23 = vadd.f32 %v125_v22, %v42_v19  ;;  %v132_v31 = vmul.f32 0.1, %v124_v24  ;;  %v1416_v22 = vld [vmem:[%s1911_s3 + $0x1d4] ss:$28 sps:$4 sm:$0xff]  }
  0xd6   :  { %v127_v25 = vpop.f32.mrf.mxu0 }
  0xd7   :  { %v128_v26 = vadd.f32 %v127_v25, %v38_v20  ;;  %v133_v28 = vmul.f32 0.1, %v126_v23  ;;  %v136_v36 = vmax.f32 %v124_v24, %v132_v31  ;;  %v1413_v20 = vld [vmem:[%s1911_s3 + $0x20c] ss:$28 sps:$4 sm:$0xff]   ;;  %v282_v24 = vsub.s32 2, %v1729_v15 }
  0xd8   :  { %v129_v27 = vpop.f32.mrf.mxu0  ;;  %v1888_v25 = vld [vmem:[%s1912_s4] sm:$0x7f] }
  0xd9   :  { %v134_v29 = vmul.f32 0.1, %v128_v26  ;;  %v130_v30 = vadd.f32 %v129_v27, %v42_v19  ;;  %v137_v34 = vmax.f32 %v126_v23, %v133_v28  ;;  %v1408_v19 = vld [vmem:[%s1911_s3 + $0x240] ss:$28 sps:$4 sm:$0xff]   ;;  %v1414_v23 = vld [vmem:[%s1911_s3 + $0x1d0] ss:$28 sps:$4 sm:$0xff]   ;;  %v275_v27 = vrot.slane %v1888_v25, %v37_v17 }
  0xda   :  { %v283_v28 = vrot.slane %v1888_v25, %v282_v24  ;;  %s1468_s3 = smov [#allocation2]  }
  0xdb   :  { %v135_v32 = vmul.f32 0.1, %v130_v30  ;;  %v138_v33 = vmax.f32 %v128_v26, %v134_v29  ;;  %v286_v26 = vsub.s32 3, %v1729_v15  ;;  %v279_v29 = vrot.slane %v1888_v25, %v41_v16  ;;  %s1087_s4 = sshll.u32 %s1468_s3, 4  ;;  %s1088_s4 = int_to_ptr.vmem [resolvable:$true] %s1087_s4 }
  0xdc   :  { %s1445_s1 = scalar_lea.vmem %s1088_s4, 1792  ;;  %p1450_p1 = scmp.lt.s32.totalorder %s1088_s4, %s1088_s4 }
  0xdd   :  { %v139_v35 = vmax.f32 %v130_v30, %v135_v32  ;;  %v1746_v40 = vpack.c.bf16 %v138_v33, %v136_v36  ;;  %v287_v30 = vrot.slane %v1888_v25, %v286_v26  ;;  %p1446_p0 = scmp.ne.s32.totalorder %s1088_s4, %s1445_s1  ;;  %p1451_p2 = scmp.lt.s32.totalorder %s1445_s1, %s1445_s1 }
  0xdf   :  { %v141_v37 = vpack.c.bf16 %v139_v35, %v137_v34  ;;  %p1452_p3 = por %p1451_p2, %p1450_p1 }
  0xe1   :  { %915 = vmatprep.mubr.bf16.mxu1 %v141_v37  ;;  %958 = vmatprep.mubr.bf16.mxu0 %v141_v37  ;;  %p1453_p4 = pnand %p1452_p3, %p1446_p0 }
  0xe2   :  { %916 = vmatmul.mubr.bf16.vlgmr.msra.gmra.mxu1 %v1746_v40  ;;  %959 = vmatmul.mubr.bf16.vlgmr.msra.gmra.mxu0 %v1746_v40 }
  0xe3   :  { %970 = vmatpush1.bf16.msra.mxu1 %v1353_v38  ;;  %1220 = vmatpush3.bf16.msra.mxu0 %v1357_v39 }
  0xe4   :  { %1001 = vmatprep.mubr.bf16.mxu1 %v141_v37  ;;  %1044 = vmatprep.mubr.bf16.mxu0 %v141_v37 }
  0xe5   :  { %971 = vmatprep.subr.bf16.mxu1 %v1360_v41  ;;  %1221 = vmatprep.subr.bf16.mxu0 %v1361_v42 }
  0xe7   :  { %972 = vmatpush1.bf16.msra.mxu1 %v1358_v43  ;;  %1222 = vmatpush3.bf16.msra.mxu0 %v1362_v44 }
  0xe8   :  { %973 = vmatprep.subr.bf16.mxu1 %v1365_v45  ;;  %1223 = vmatprep.subr.bf16.mxu0 %v1366_v46 }
  0xeb   :  { %974 = vmatpush1.bf16.msra.mxu1 %v1363_v47  ;;  %1224 = vmatpush3.bf16.msra.mxu0 %v1367_v48 }
  0xec   :  { %975 = vmatprep.subr.bf16.mxu1 %v1370_v49  ;;  %1225 = vmatprep.subr.bf16.mxu0 %v1371_v50 }
  0xef   :  { %976 = vmatpush1.bf16.msra.mxu1 %v1368_v51  ;;  %1226 = vmatpush3.bf16.msra.mxu0 %v1372_v52 }
  0xf0   :  { %977 = vmatprep.subr.bf16.mxu1 %v1375_v53  ;;  %1227 = vmatprep.subr.bf16.mxu0 %v1376_v54  ;;  %v298_v53 = vsub.s32 6, %v1729_v15 }
  0xf3   :  { %978 = vmatpush1.bf16.msra.mxu1 %v1373_v55  ;;  %1228 = vmatpush3.bf16.msra.mxu0 %v1377_v56  ;;  %v299_v55 = vrot.slane %v1888_v25, %v298_v53 }
  0xf4   :  { %979 = vmatprep.subr.bf16.mxu1 %v1380_v57  ;;  %1229 = vmatprep.subr.bf16.mxu0 %v1381_v58 }
  0xf7   :  { %980 = vmatpush1.bf16.msra.mxu1 %v1378_v59  ;;  %1230 = vmatpush3.bf16.msra.mxu0 %v1382_v60 }
  0xf8   :  { %981 = vmatprep.subr.bf16.mxu1 %v1385_v61  ;;  %1231 = vmatprep.subr.bf16.mxu0 %v1386_v62 }
  0xfb   :  { %982 = vmatpush1.bf16.msra.mxu1 %v1383_v63  ;;  %1232 = vmatpush3.bf16.msra.mxu0 %v1387_v0 }
  0xfc   :  { %983 = vmatprep.subr.bf16.mxu1 %v1390_v1  ;;  %1233 = vmatprep.subr.bf16.mxu0 %v1391_v2  ;;  %v290_v1 = vsub.s32 4, %v1729_v15  ;;  %v294_v2 = vsub.s32 5, %v1729_v15 }
  0xff   :  { %984 = vmatpush1.bf16.msra.mxu1 %v1388_v3  ;;  %1234 = vmatpush3.bf16.msra.mxu0 %v1392_v4  ;;  %v291_v3 = vrot.slane %v1888_v25, %v290_v1  ;;  %v295_v4 = vrot.slane %v1888_v25, %v294_v2 }
 0x100   :  { %985 = vmatprep.subr.bf16.mxu1 %v1395_v5 }
 0x102   :  { %1045 = vmatmul.mubr.bf16.vlgmr.msra.gmra.mxu0 %v1746_v40 }
 0x103   :  { %986 = vmatpush2.bf16.msra.mxu1 %v1393_v6 }
 0x104   :  { %987 = vmatprep.subr.bf16.mxu1 %v1398_v7 }
 0x107   :  { %988 = vmatpush2.bf16.msra.mxu1 %v1396_v8 }
 0x108   :  { %989 = vmatprep.subr.bf16.mxu1 %v1401_v9 }
 0x10b   :  { %990 = vmatpush2.bf16.msra.mxu1 %v1399_v10 }
 0x10c   :  { %991 = vmatprep.subr.bf16.mxu1 %v1404_v11 }
 0x10f   :  { %992 = vmatpush2.bf16.msra.mxu1 %v1402_v12 }
 0x110   :  { %993 = vmatprep.subr.bf16.mxu1 %v1407_v13 }
 0x113   :  { %994 = vmatpush2.bf16.msra.mxu1 %v1405_v14 }
 0x114   :  { %995 = vmatprep.subr.bf16.mxu1 %v1410_v18 }
 0x117   :  { %996 = vmatpush2.bf16.msra.mxu1 %v1408_v19 }
 0x118   :  { %997 = vmatprep.subr.bf16.mxu1 %v1413_v20 }
 0x11b   :  { %998 = vmatpush2.bf16.msra.mxu1 %v1411_v21 }
 0x11c   :  { %999 = vmatprep.subr.bf16.mxu1 %v1416_v22 }
 0x11f   :  { %1000 = vmatpush2.bf16.msra.mxu1 %v1414_v23 }
 0x122   :  { %1002 = vmatmul.mubr.bf16.vlgmr.msra.gmra.mxu1 %v1746_v40 }
 0x1a2   :  { %v917_v31 = vpop.f32.mrf.mxu1  ;;  %v960_v32 = vpop.f32.mrf.mxu0 }
 0x1a3   :  { %v918_v33 = vadd.f32 %v917_v31, %v275_v27  ;;  %v961_v34 = vadd.f32 %v960_v32, %v283_v28 }
 0x1a4   :  { %v919_v35 = vpop.f32.mrf.mxu1  ;;  %v962_v36 = vpop.f32.mrf.mxu0 }
 0x1a5   :  { %1417 = vtanh.f32 %v918_v33  ;;  %v920_v37 = vadd.f32 %v919_v35, %v279_v29  ;;  %v963_v38 = vadd.f32 %v962_v36, %v287_v30 }
 0x1a6   :  { %1419 = vtanh.f32 %v961_v34  ;;  %v921_v39 = vpop.f32.mrf.mxu1  ;;  %v964_v17 = vpop.f32.mrf.mxu0 }
 0x1a7   :  { %1421 = vtanh.f32 %v920_v37  ;;  %v922_v40 = vadd.f32 %v921_v39, %v275_v27  ;;  %v965_v41 = vadd.f32 %v964_v17, %v283_v28 }
 0x1a8   :  { %1423 = vtanh.f32 %v963_v38  ;;  %v923_v42 = vpop.f32.mrf.mxu1  ;;  %v966_v16 = vpop.f32.mrf.mxu0 }
 0x1a9   :  { %1425 = vtanh.f32 %v922_v40  ;;  %v924_v43 = vadd.f32 %v923_v42, %v279_v29  ;;  %v967_v44 = vadd.f32 %v966_v16, %v287_v30 }
 0x1aa   :  { %1427 = vtanh.f32 %v965_v41 }
 0x1ab   :  { %1429 = vtanh.f32 %v924_v43 }
 0x1ac   :  { %1431 = vtanh.f32 %v967_v44 }
 0x1b2   :  { %v1418_v45 = vpop.eup %1417 }
 0x1b3   :  { %v1420_v46 = vpop.eup %1419  ;;  %1067 = vst [vmem:[#allocation2] sm:$0xff] %v1418_v45 }
 0x1b4   :  { %v1422_v47 = vpop.eup %1421  ;;  %1069 = vst [vmem:[#allocation2 + $0x10] sm:$0xff] %v1420_v46 }
 0x1b5   :  { %v1424_v48 = vpop.eup %1423  ;;  %1068 = vst [vmem:[#allocation2 + $0x8] sm:$0xff] %v1422_v47 }
 0x1b6   :  { %v1426_v49 = vpop.eup %1425  ;;  %1070 = vst [vmem:[#allocation2 + $0x18] sm:$0xff] %v1424_v48 }
 0x1b7   :  { %v1428_v50 = vpop.eup %1427  ;;  %1075 = vst [vmem:[#allocation2 + $0x38] sm:$0xff] %v1426_v49 }
 0x1b8   :  { %v1430_v51 = vpop.eup %1429  ;;  %1077 = vst [vmem:[#allocation2 + $0x48] sm:$0xff] %v1428_v50 }
 0x1b9   :  { %v1432_v52 = vpop.eup %1431  ;;  %1076 = vst [vmem:[#allocation2 + $0x40] sm:$0xff] %v1430_v51 }
 0x1ba   :  { %1078 = vst [vmem:[#allocation2 + $0x50] sm:$0xff] %v1432_v52 }
 0x1c2   :  { %v1235_v54 = vpop.f32.mrf.mxu0 }
 0x1c4   :  { %v1236_v56 = vpop.f32.mrf.mxu0 }
 0x1c5   :  { %v1237_v57 = vadd.f32 %v1236_v56, %v1235_v54 }
 0x1c6   :  { %v1238_v58 = vpop.f32.mrf.mxu0 }
 0x1c7   :  { %v1047_v59 = vadd.f32 %v1237_v57, %v299_v55 }
 0x1c8   :  { %v1239_v60 = vpop.f32.mrf.mxu0 }
 0x1c9   :  { %1433 = vtanh.f32 %v1047_v59  ;;  %v1240_v61 = vadd.f32 %v1239_v60, %v1238_v58 }
 0x1cb   :  { %v1050_v62 = vadd.f32 %v1240_v61, %v299_v55 }
 0x1cd   :  { %1435 = vtanh.f32 %v1050_v62 }
 0x1d6   :  { %v1434_v63 = vpop.eup %1433 }
 0x1d7   :  { %1074 = vst.msk [vmem:[#allocation2 + $0x30] sm:$0xff] %vm1073_vm1, %v1434_v63 }
 0x1da   :  { %v1436_v0 = vpop.eup %1435 }
 0x1db   :  { %1081 = vst.msk [vmem:[#allocation2 + $0x68] sm:$0xff] %vm1073_vm1, %v1436_v0 }
 0x1e2   :  { %v1003_v5 = vpop.f32.mrf.mxu1 }
 0x1e3   :  { %v1004_v6 = vadd.f32 %v1003_v5, %v291_v3 }
 0x1e4   :  { %v1005_v7 = vpop.f32.mrf.mxu1 }
 0x1e5   :  { %1437 = vtanh.f32 %v1004_v6  ;;  %v1006_v8 = vadd.f32 %v1005_v7, %v295_v4 }
 0x1e6   :  { %v1007_v9 = vpop.f32.mrf.mxu1 }
 0x1e7   :  { %1439 = vtanh.f32 %v1006_v8  ;;  %v1008_v10 = vadd.f32 %v1007_v9, %v291_v3 }
 0x1e8   :  { %v1009_v11 = vpop.f32.mrf.mxu1 }
 0x1e9   :  { %1441 = vtanh.f32 %v1008_v10  ;;  %v1010_v12 = vadd.f32 %v1009_v11, %v295_v4 }
 0x1eb   :  { %1443 = vtanh.f32 %v1010_v12 }
 0x1f2   :  { %v1438_v13 = vpop.eup %1437 }
 0x1f3   :  { %1071 = vst [vmem:[#allocation2 + $0x20] sm:$0xff] %v1438_v13 }
 0x1f4   :  { %v1440_v15 = vpop.eup %1439 }
 0x1f5   :  { %1072 = vst [vmem:[#allocation2 + $0x28] sm:$0xff] %v1440_v15 }
 0x1f6   :  { %v1442_v14 = vpop.eup %1441 }
 0x1f7   :  { %1079 = vst [vmem:[#allocation2 + $0x58] sm:$0xff] %v1442_v14 }
 0x1f8   :  { %v1444_v18 = vpop.eup %1443 }
 0x1f9   :  { %1080 = vst [vmem:[#allocation2 + $0x60] sm:$0xff] %v1444_v18 }
 0x1fa   :  { %1456 = shalt.err (!%p1453_p4)
}
 0x1fb   :  { %s1469_s21 = smov 896   ;;  %s1470_s22 = smov 56  }
 0x1fc   :  { %1093 = dma.vmem_to_hbm [thread:$0]  %s1088_s4, 1792, %s1913_s5, [#allocation3], %s1469_s21, %s1469_s21, %s1470_s22  }
 0x1fd   :  { %1465 = dma.done.wait [#allocation3], 1792  }
 0x1fe   :  { %1466 = vsyncadd [#allocation3], 4294965504 }
 0x1ff   :  { %1097 = vsyncpa [#allocation3], 1 }

</bundles_post_ra>
